<compile_context>
chip_gen: v5e
topology: v5e:2x2
jax: 0.10.0
libtpu: 0.0.40
codegen_flags: <defaults>
</compile_context>

<pallas_src>
import functools
import math

import jax
import jax.numpy as jnp
from jax.experimental import pallas as pl
from jax.experimental.pallas import tpu as pltpu


def _round_up(x, m):
    return ((x + m - 1) // m) * m


def _pick_intermediate_tile(I, max_ti=2048):
    """Largest multiple-of-128 divisor of I that is <= max_ti, else I.

    The intermediate dim is a reduction axis for the second matmul, so its
    blocks must tile I exactly (a partial block would feed garbage into the
    accumulator)."""
    ti = max_ti
    while ti >= 128:
        if I % ti == 0:
            return ti
        ti //= 2
    return I


def _ffn_kernel(x_ref, w1_ref, b1_ref, w2_ref, b2_ref, o_ref, acc_ref,
                *, approximate_gelu):
    # x_ref:  (tm, H)   input rows (native dtype; cast to bf16 here)
    # w1_ref: (H, tI)   bf16 first-layer weight block
    # b1_ref: (1, tI)   f32
    # w2_ref: (tI, H)   bf16 second-layer weight block
    # b2_ref: (1, H)    f32
    # o_ref:  (tm, H)   output tile (resident across the intermediate axis)
    # acc_ref:(tm, H)   f32 scratch accumulator
    j = pl.program_id(1)

    @pl.when(j == 0)
    def _init():
        acc_ref[...] = jnp.zeros_like(acc_ref)

    # In-kernel bf16 cast: free VPU op, avoids a wrapper-side HBM pass over x.
    x = x_ref[...].astype(jnp.bfloat16)

    # W_1(e) + b_1 : bf16 on the MXU, f32 accumulation.
    h = jnp.dot(x, w1_ref[...], preferred_element_type=jnp.float32)
    h = h + b1_ref[...]

    if approximate_gelu:
        # tanh-form GELU: transcendental goes to the EUP slot (VALU relief).
        h = jax.nn.gelu(h, approximate=True)
    else:
        # Exact erf GELU (BERT's ACT2FN["gelu"]) — heavier on the VPU.
        h = 0.5 * h * (1.0 + jax.lax.erf(h * (1.0 / math.sqrt(2.0))))

    # dropout: identity in eval mode.
    # TODO(synk): training-mode dropout mask not emitted.

    # Partial W_2 contribution for this intermediate block.
    acc_ref[...] += jnp.dot(h.astype(jnp.bfloat16), w2_ref[...],
                            preferred_element_type=jnp.float32)

    @pl.when(j == pl.num_programs(1) - 1)
    def _finalize():
        o_ref[...] = (acc_ref[...] + b2_ref[...]).astype(o_ref.dtype)


@functools.partial(jax.jit, static_argnames=("tm", "ti", "approximate_gelu"))
def feed_forward_layer(x, w1, b1, w2, b2, *, tm=256, ti=None,
                       approximate_gelu=True):
    """x: [B, S, H].  w1: [H, I], b1: [I], w2: [I, H], b2: [H].

    Returns [B, S, H] in x.dtype.  Pre-cast w1/w2 to bf16 at parameter load to
    avoid a per-call weight cast (the astype below is then a no-op).
    """
    B, S, H = x.shape
    I = w1.shape[1]
    M = B * S

    # Row tile: feeds the 256-row MXU; clamped for small M.  Ragged tails are
    # handled by pl.cdiv partial blocks (stores masked, no jnp.pad copy).
    tm_eff = max(8, min(tm, _round_up(M, 8)))
    grid_m = pl.cdiv(M, tm_eff)

    # Intermediate-dim block ("arbitrary" reduction axis).
    ti_eff = ti if ti is not None else _pick_intermediate_tile(I)
    assert I % ti_eff == 0, "intermediate tile must divide intermediate_size"
    grid_i = I // ti_eff
    weights_resident = (grid_i == 1)

    x2d = x.reshape(M, H)
    w1_bf = w1.astype(jnp.bfloat16)      # no-op if caller pre-cast
    w2_bf = w2.astype(jnp.bfloat16)
    b1_2d = b1.reshape(1, I).astype(jnp.float32)
    b2_2d = b2.reshape(1, H).astype(jnp.float32)

    # Weight BlockSpecs: when the whole I fits in one block the index_map is
    # constant, so single-buffer them (they're only DMA'd once; Buffered(2)
    # would just double their VMEM footprint).  When I is blocked, keep the
    # default double-buffering so weight DMAs overlap the MXU.
    if weights_resident:
        w1_spec = pl.BlockSpec((H, ti_eff), lambda i, j: (0, 0),
                               pipeline_mode=pl.Buffered(1))
        w2_spec = pl.BlockSpec((ti_eff, H), lambda i, j: (0, 0),
                               pipeline_mode=pl.Buffered(1))
    else:
        w1_spec = pl.BlockSpec((H, ti_eff), lambda i, j: (0, j))
        w2_spec = pl.BlockSpec((ti_eff, H), lambda i, j: (j, 0))

    # Honest VMEM budget.
    x_isz = x.dtype.itemsize
    wbuf = 1 if weights_resident else 2
    weight_bytes = wbuf * (H * ti_eff + ti_eff * H) * 2          # bf16 blocks
    bias_bytes = 2 * (ti_eff * 4 + H * 4)                        # double-buffered biases
    io_bytes = 2 * tm_eff * H * x_isz + 2 * tm_eff * H * x_isz   # x + out tiles, x2 buffers
    acc_bytes = tm_eff * H * 4                                   # f32 accumulator scratch
    h_bytes = tm_eff * ti_eff * (4 + 2 + 4)                      # f32 h + bf16 copy + gelu temps
    vmem_need = weight_bytes + bias_bytes + io_bytes + acc_bytes + h_bytes + (4 << 20)

    # Don't request 100% of physical VMEM (Mosaic needs internal scratch):
    # clamp to 75% -> ~48 MiB on v7x, ~96 MiB on v5e/v6e.
    try:
        phys_vmem = pltpu.get_tpu_info().vmem_capacity_bytes
    except Exception:
        phys_vmem = 64 << 20   # conservative (v7x per-TC)
    vmem_limit = int(min(max(vmem_need, 32 << 20), (phys_vmem * 3) // 4))

    flops = 4 * M * H * I                                        # two matmuls
    weight_stream = (H * I + I * H) * 2 * (1 if weights_resident else grid_m)
    bytes_accessed = M * H * x_isz + M * H * x_isz + weight_stream + (I + H) * 4

    out2d = pl.pallas_call(
        functools.partial(_ffn_kernel, approximate_gelu=approximate_gelu),
        out_shape=jax.ShapeDtypeStruct((M, H), x.dtype),
        grid_spec=pltpu.PrefetchScalarGridSpec(
            num_scalar_prefetch=0,
            grid=(grid_m, grid_i),                               # reduction axis last
            in_specs=[
                pl.BlockSpec((tm_eff, H), lambda i, j: (i, 0)),  # x tile (resident over j)
                w1_spec,                                         # W1 block
                pl.BlockSpec((1, ti_eff), lambda i, j: (0, j)),  # b1 block
                w2_spec,                                         # W2 block
                pl.BlockSpec((1, H), lambda i, j: (0, 0)),       # b2
            ],
            out_specs=pl.BlockSpec((tm_eff, H), lambda i, j: (i, 0)),
            scratch_shapes=[pltpu.VMEM((tm_eff, H), jnp.float32)],
        ),
        compiler_params=pltpu.CompilerParams(
            dimension_semantics=("parallel", "arbitrary"),
            vmem_limit_bytes=vmem_limit),
        cost_estimate=pl.CostEstimate(
            flops=int(flops),
            transcendentals=int(M * I),
            bytes_accessed=int(bytes_accessed)),
    )(x2d, w1_bf, b1_2d, w2_bf, b2_2d)

    return out2d.reshape(B, S, H)


if __name__ == "__main__":
    # config: hidden_size=32, intermediate_size=128 (4x), batch=2, seq=8
    B, S, H, I = 2, 8, 32, 128

    key = jax.random.PRNGKey(0)
    kx, kw1, kb1, kw2, kb2 = jax.random.split(key, 5)

    x = jax.random.normal(kx, (B, S, H), dtype=jnp.float32)

    # deterministic "Linear" parameter init (uniform, same fan-in scaling as torch)
    lim1 = 1.0 / math.sqrt(H)
    lim2 = 1.0 / math.sqrt(I)
    w1 = jax.random.uniform(kw1, (H, I), minval=-lim1, maxval=lim1,
                            dtype=jnp.float32)   # = torch W_1.weight.T
    b1 = jax.random.uniform(kb1, (I,), minval=-lim1, maxval=lim1,
                            dtype=jnp.float32)
    w2 = jax.random.uniform(kw2, (I, H), minval=-lim2, maxval=lim2,
                            dtype=jnp.float32)   # = torch W_2.weight.T
    b2 = jax.random.uniform(kb2, (H,), minval=-lim2, maxval=lim2,
                            dtype=jnp.float32)

    # Pre-cast weights to bf16 once (parameter-load time), per perf review;
    # removes the per-call weight cast/HBM pass in the wrapper.
    w1_bf = w1.astype(jnp.bfloat16)
    w2_bf = w2.astype(jnp.bfloat16)

    out = feed_forward_layer(x, w1_bf, b1, w2_bf, b2)
    jax.block_until_ready(out)

    # sanity check against a plain-JAX f32 reference (same tanh-GELU variant);
    # kernel runs the MXU in bf16 with f32 accumulation, so allow ~1e-2-level
    # deviation.
    ref = jax.nn.gelu(x.reshape(-1, H) @ w1 + b1, approximate=True) @ w2 + b2
    ref = ref.reshape(B, S, H)
    assert out.shape == (B, S, H)
    assert jnp.allclose(out, ref, atol=5e-2, rtol=5e-2)

    print("KERNEL_OK")
</pallas_src>

<mosaic_0001>
module attributes {stable_mosaic.version = 11 : i64} {
  func.func @_ffn_kernel(%arg0: i32, %arg1: i32, %arg2: memref<16x32xf32, #tpu.memory_space<vmem>>, %arg3: memref<32x128xbf16, #tpu.memory_space<vmem>>, %arg4: memref<1x128xf32, #tpu.memory_space<vmem>>, %arg5: memref<128x32xbf16, #tpu.memory_space<vmem>>, %arg6: memref<1x32xf32, #tpu.memory_space<vmem>>, %arg7: memref<16x32xf32, #tpu.memory_space<vmem>>, %arg8: memref<16x32xf32, #tpu.memory_space<vmem>>) attributes {dimension_semantics = [#tpu.dimension_semantics<parallel>, #tpu.dimension_semantics<arbitrary>], iteration_bounds = array<i64: 1, 1>, scalar_prefetch = 0 : i64, scratch_operands = 1 : i64, tpu.core_type = #tpu.core_type<tc>, window_params = [{transform_indices = @transform_0, window_bounds = array<i64: 16, 32>}, {pipeline_mode = #tpu.pipeline_mode<synchronous>, transform_indices = @transform_1, window_bounds = array<i64: 32, 128>}, {transform_indices = @transform_2, window_bounds = array<i64: 1, 128>}, {pipeline_mode = #tpu.pipeline_mode<synchronous>, transform_indices = @transform_3, window_bounds = array<i64: 128, 32>}, {pipeline_mode = #tpu.pipeline_mode<synchronous>, transform_indices = @transform_4, window_bounds = array<i64: 1, 32>}, {transform_indices = @transform_5, window_bounds = array<i64: 16, 32>}]} {
    %c0_i32 = arith.constant 0 : i32
    %0 = arith.cmpi eq, %arg1, %c0_i32 : i32
    %1 = arith.extui %0 : i1 to i32
    %c0_i32_0 = arith.constant 0 : i32
    %2 = arith.cmpi ne, %1, %c0_i32_0 : i32
    scf.if %2 {
      %cst_19 = arith.constant 0.000000e+00 : f32
      %32 = vector.broadcast %cst_19 : f32 to vector<16x32xf32>
      %c0_20 = arith.constant 0 : index
      %c0_21 = arith.constant 0 : index
      %33 = vector.load %arg8[%c0_20, %c0_21] : memref<16x32xf32, #tpu.memory_space<vmem>>, vector<16x32xf32>
      tpu.vector_store %arg8[%c0_20, %c0_21], %32 {strides = array<i32>} : memref<16x32xf32, #tpu.memory_space<vmem>>, vector<16x32xf32>,
    } else {
    }
    %c0 = arith.constant 0 : index
    %c0_1 = arith.constant 0 : index
    %3 = vector.load %arg2[%c0, %c0_1] : memref<16x32xf32, #tpu.memory_space<vmem>>, vector<16x32xf32>
    %4 = arith.truncf %3 : vector<16x32xf32> to vector<16x32xbf16>
    %c0_2 = arith.constant 0 : index
    %c0_3 = arith.constant 0 : index
    %5 = vector.load %arg3[%c0_2, %c0_3] : memref<32x128xbf16, #tpu.memory_space<vmem>>, vector<32x128xbf16>
    %cst = arith.constant dense<0.000000e+00> : vector<16x128xf32>
    %6 = tpu.matmul %4, %5, %cst {dimension_numbers = #tpu.dot_dimension_numbers<[1], [0], [0], [1], [0, 0, 1, 1], [], []>} : vector<16x32xbf16>, vector<32x128xbf16>, vector<16x128xf32> -> vector<16x128xf32>
    %c0_4 = arith.constant 0 : index
    %c0_5 = arith.constant 0 : index
    %7 = vector.load %arg4[%c0_4, %c0_5] : memref<1x128xf32, #tpu.memory_space<vmem>>, vector<1x128xf32>
    %8 = vector.broadcast %7 : vector<1x128xf32> to vector<16x128xf32>
    %9 = arith.addf %6, %8 : vector<16x128xf32>
    %10 = arith.mulf %9, %9 : vector<16x128xf32>
    %11 = arith.mulf %9, %10 : vector<16x128xf32>
    %cst_6 = arith.constant 4.471500e-02 : f32
    %12 = vector.broadcast %cst_6 : f32 to vector<16x128xf32>
    %13 = arith.mulf %12, %11 : vector<16x128xf32>
    %14 = arith.addf %9, %13 : vector<16x128xf32>
    %cst_7 = arith.constant 0.797884583 : f32
    %15 = vector.broadcast %cst_7 : f32 to vector<16x128xf32>
    %16 = arith.mulf %15, %14 : vector<16x128xf32>
    %17 = math.tanh %16 : vector<16x128xf32>
    %cst_8 = arith.constant 1.000000e+00 : f32
    %18 = vector.broadcast %cst_8 : f32 to vector<16x128xf32>
    %19 = arith.addf %18, %17 : vector<16x128xf32>
    %cst_9 = arith.constant 5.000000e-01 : f32
    %20 = vector.broadcast %cst_9 : f32 to vector<16x128xf32>
    %21 = arith.mulf %20, %19 : vector<16x128xf32>
    %22 = arith.mulf %9, %21 : vector<16x128xf32>
    %c0_10 = arith.constant 0 : index
    %c0_11 = arith.constant 0 : index
    %23 = vector.load %arg8[%c0_10, %c0_11] : memref<16x32xf32, #tpu.memory_space<vmem>>, vector<16x32xf32>
    %24 = arith.truncf %22 : vector<16x128xf32> to vector<16x128xbf16>
    %c0_12 = arith.constant 0 : index
    %c0_13 = arith.constant 0 : index
    %25 = vector.load %arg5[%c0_12, %c0_13] : memref<128x32xbf16, #tpu.memory_space<vmem>>, vector<128x32xbf16>
    %cst_14 = arith.constant dense<0.000000e+00> : vector<16x32xf32>
    %26 = tpu.matmul %24, %25, %cst_14 {dimension_numbers = #tpu.dot_dimension_numbers<[1], [0], [0], [1], [0, 0, 1, 1], [], []>} : vector<16x128xbf16>, vector<128x32xbf16>, vector<16x32xf32> -> vector<16x32xf32>
    %27 = arith.addf %23, %26 : vector<16x32xf32>
    %c0_15 = arith.constant 0 : index
    %c0_16 = arith.constant 0 : index
    %28 = vector.load %arg8[%c0_15, %c0_16] : memref<16x32xf32, #tpu.memory_space<vmem>>, vector<16x32xf32>
    tpu.vector_store %arg8[%c0_15, %c0_16], %27 {strides = array<i32>} : memref<16x32xf32, #tpu.memory_space<vmem>>, vector<16x32xf32>,
    %c0_i32_17 = arith.constant 0 : i32
    %29 = arith.cmpi eq, %arg1, %c0_i32_17 : i32
    %30 = arith.extui %29 : i1 to i32
    %c0_i32_18 = arith.constant 0 : i32
    %31 = arith.cmpi ne, %30, %c0_i32_18 : i32
    scf.if %31 {
      %c0_19 = arith.constant 0 : index
      %c0_20 = arith.constant 0 : index
      %32 = vector.load %arg8[%c0_19, %c0_20] : memref<16x32xf32, #tpu.memory_space<vmem>>, vector<16x32xf32>
      %c0_21 = arith.constant 0 : index
      %c0_22 = arith.constant 0 : index
      %33 = vector.load %arg6[%c0_21, %c0_22] : memref<1x32xf32, #tpu.memory_space<vmem>>, vector<1x32xf32>
      %34 = vector.broadcast %33 : vector<1x32xf32> to vector<16x32xf32>
      %35 = arith.addf %32, %34 : vector<16x32xf32>
      %c0_23 = arith.constant 0 : index
      %c0_24 = arith.constant 0 : index
      %36 = vector.load %arg7[%c0_23, %c0_24] : memref<16x32xf32, #tpu.memory_space<vmem>>, vector<16x32xf32>
      tpu.vector_store %arg7[%c0_23, %c0_24], %35 {strides = array<i32>} : memref<16x32xf32, #tpu.memory_space<vmem>>, vector<16x32xf32>,
    } else {
    }
    return
  }
  func.func @transform_0(%arg0: i32, %arg1: i32) -> (i32, i32) {
    %c0_i32 = arith.constant 0 : i32
    %c0_i32_0 = arith.constant 0 : i32
    return %arg0, %c0_i32 : i32, i32
  }
  func.func @transform_1(%arg0: i32, %arg1: i32) -> (i32, i32) {
    %c0_i32 = arith.constant 0 : i32
    %c0_i32_0 = arith.constant 0 : i32
    %c0_i32_1 = arith.constant 0 : i32
    return %c0_i32, %c0_i32_0 : i32, i32
  }
  func.func @transform_2(%arg0: i32, %arg1: i32) -> (i32, i32) {
    %c0_i32 = arith.constant 0 : i32
    %c0_i32_0 = arith.constant 0 : i32
    return %c0_i32, %arg1 : i32, i32
  }
  func.func @transform_3(%arg0: i32, %arg1: i32) -> (i32, i32) {
    %c0_i32 = arith.constant 0 : i32
    %c0_i32_0 = arith.constant 0 : i32
    %c0_i32_1 = arith.constant 0 : i32
    return %c0_i32, %c0_i32_0 : i32, i32
  }
  func.func @transform_4(%arg0: i32, %arg1: i32) -> (i32, i32) {
    %c0_i32 = arith.constant 0 : i32
    %c0_i32_0 = arith.constant 0 : i32
    %c0_i32_1 = arith.constant 0 : i32
    return %c0_i32, %c0_i32_0 : i32, i32
  }
  func.func @transform_5(%arg0: i32, %arg1: i32) -> (i32, i32) {
    %c0_i32 = arith.constant 0 : i32
    %c0_i32_0 = arith.constant 0 : i32
    return %arg0, %c0_i32 : i32, i32
  }
}

</mosaic_0001>

<bundles_post_ra>
// kernel: feed_forward_layer.1
= control target key start
LH: loop header
LB: loop body
LE: loop exit
PB: predicated region body
PF: predicated region fallthrough
CT: control target
= control target key end

     0   :  { %s377_s0 = inlined_call_operand.vmem [shape: f32[16,32], index: 0, kind: input, shape index: {}]   ;;  %s378_s1 = inlined_call_operand.vmem [shape: bf16[32,128], index: 1, kind: input, shape index: {}]   ;;  %s379_s2 = inlined_call_operand.vmem [shape: f32[1,128], index: 2, kind: input, shape index: {}]   ;;  %s380_s3 = inlined_call_operand.vmem [shape: bf16[128,32], index: 3, kind: input, shape index: {}]   ;;  %s381_s4 = inlined_call_operand.vmem [shape: f32[1,32], index: 4, kind: input, shape index: {}]   ;;  %s382_s5 = inlined_call_operand.hbm [shape: f32[16,32], index: 5, kind: output, shape index: {}]  }
   0x1   :  { %v246_v0 = vld [vmem:[%s378_s1 + $0x8] sm:$0xff]  ;;  %v245_v1 = vld [vmem:[%s378_s1] sm:$0xff] }
   0x2   :  { %v29_v2 = vld [vmem:[%s377_s0] sm:$0xff]  ;;  %62 = vmatpush.bf16.msra.mxu0 %v246_v0  ;;  %v30_v3 = vld [vmem:[%s377_s0 + $0x8] sm:$0xff] }
   0x3   :  { %10 = vsyncpa [#allocation4], 0  ;;  %v31_v4 = vpack.c.bf16 %v30_v3, %v29_v2  ;;  %vm26_vm0 = vcmask 261120   ;;  %v254_v5 = vld [vmem:[%s380_s3 + $0x38] sm:$0xff]  ;;  %v253_v6 = vld [vmem:[%s380_s3 + $0x30] sm:$0xff]  ;;  %v291_v18 = vmov 0.0  }
   0x4   :  { %155 = vmatpush.bf16.msra.mxu1 %v254_v5  ;;  %v252_v7 = vld [vmem:[%s380_s3 + $0x28] sm:$0xff]  ;;  %v251_v8 = vld [vmem:[%s380_s3 + $0x20] sm:$0xff]  ;;  %v250_v9 = vld [vmem:[%s380_s3 + $0x18] sm:$0xff]  ;;  %27 = vst.msk [vmem:[#allocation2] sm:$0xff] %vm26_vm0, %v291_v18  ;;  %s292_s17 = smov [#allocation3]   ;;  %s192_s21 = sshll.u32 %s382_s5, 4  ;;  %s193_s21 = int_to_ptr.hbm [resolvable:$true] %s192_s21 }
   0x5   :  { %v249_v10 = vld [vmem:[%s380_s3 + $0x10] sm:$0xff]  ;;  %v248_v11 = vld [vmem:[%s380_s3 + $0x8] sm:$0xff]  ;;  %v259_v12 = vld [vmem:[%s379_s2] ss:$0 sm:$0xff]  ;;  %28 = vst.msk [vmem:[#allocation2 + $0x8] sm:$0xff] %vm26_vm0, %v291_v18  ;;  %s190_s18 = sshll.u32 %s292_s17, 4  ;;  %s191_s18 = int_to_ptr.vmem [resolvable:$true] %s190_s18 }
   0x6   :  { %63 = vmatpush.bf16.msra.mxu0 %v245_v1  ;;  %v247_v13 = vld [vmem:[%s380_s3] sm:$0xff]  ;;  %s294_s22 = smov 8  }
   0x7   :  { %v260_v42 = vld [vmem:[%s381_s4] ss:$0 sm:$0xff]  ;;  %s293_s4 = smov 128  }
   0x8   :  { %156 = vmatpush.bf16.msra.mxu1 %v253_v6 }
   0x9   :  { %212 = vmatmul.msk.bf16.vlgmr.msra.gmra.mxu0 %vm26_vm0, %v31_v4 }
   0xb   :  { %v88_v38 = vld [vmem:[#allocation2] sm:$0xff] }
   0xc   :  { %157 = vmatpush.bf16.msra.mxu1 %v252_v7  ;;  %v89_v41 = vld [vmem:[#allocation2 + $0x8] sm:$0xff] }
  0x10   :  { %158 = vmatpush.bf16.msra.mxu1 %v251_v8 }
  0x14   :  { %159 = vmatpush.bf16.msra.mxu1 %v250_v9 }
  0x18   :  { %160 = vmatpush.bf16.msra.mxu1 %v249_v10 }
  0x1c   :  { %161 = vmatpush.bf16.msra.mxu1 %v248_v11 }
  0x20   :  { %162 = vmatpush.bf16.msra.mxu1 %v247_v13 }
  0x86   :  { %v65_v14 = vpop.f32.mrf.mxu0 }
  0x87   :  { %v66_v15 = vadd.f32 %v259_v12, %v65_v14 }
  0x89   :  { %v70_v16 = vmul.f32 %v66_v15, %v66_v15 }
  0x8b   :  { %v72_v17 = vmul.f32 %v70_v16, %v66_v15 }
  0x8d   :  { %v74_v19 = vmul.f32 0.044715, %v72_v17 }
  0x8e   :  { %v67_v20 = vpop.f32.mrf.mxu0 }
  0x8f   :  { %v76_v21 = vadd.f32 %v74_v19, %v66_v15  ;;  %v68_v22 = vadd.f32 %v259_v12, %v67_v20 }
  0x91   :  { %v71_v23 = vmul.f32 %v68_v22, %v68_v22  ;;  %v78_v24 = vmul.f32 0.7978846, %v76_v21 }
  0x93   :  { %v73_v25 = vmul.f32 %v71_v23, %v68_v22  ;;  %261 = vtanh.f32 %v78_v24 }
  0x95   :  { %v75_v26 = vmul.f32 0.044715, %v73_v25 }
  0x97   :  { %v77_v27 = vadd.f32 %v75_v26, %v68_v22 }
  0x99   :  { %v79_v28 = vmul.f32 0.7978846, %v77_v27  ;;  %v262_v29 = vpop.eup %261 }
  0x9a   :  { %v82_v30 = vadd.f32 1.0, %v262_v29 }
  0x9b   :  { %263 = vtanh.f32 %v79_v28 }
  0x9c   :  { %v84_v33 = vmul.f32 0.5, %v82_v30 }
  0x9e   :  { %v86_v35 = vmul.f32 %v84_v33, %v66_v15 }
  0xa1   :  { %v264_v31 = vpop.eup %263 }
  0xa2   :  { %v83_v32 = vadd.f32 1.0, %v264_v31 }
  0xa4   :  { %v85_v34 = vmul.f32 0.5, %v83_v32 }
  0xa6   :  { %v87_v36 = vmul.f32 %v85_v34, %v68_v22 }
  0xa8   :  { %v90_v37 = vpack.c.bf16 %v87_v36, %v86_v35 }
  0xaa   :  { %163 = vmatmul.bf16.vlgmr.msra.gmra.mxu1 %v90_v37 }
 0x127   :  { %v164_v39 = vpop.f32.mrf.mxu1 }
 0x128   :  { %v169_v40 = vadd.f32 %v164_v39, %v88_v38 }
 0x12a   :  { %171 = vst.msk [vmem:[#allocation2] sm:$0xff] %vm26_vm0, %v169_v40 }
 0x12f   :  { %v166_v43 = vpop.f32.mrf.mxu1 }
 0x130   :  { %v170_v44 = vadd.f32 %v166_v43, %v89_v41 }
 0x131   :  { %v176_v45 = vld [vmem:[#allocation2] sm:$0xff] }
 0x132   :  { %172 = vst.msk [vmem:[#allocation2 + $0x8] sm:$0xff] %vm26_vm0, %v170_v44  ;;  %v182_v46 = vadd.f32 %v260_v42, %v176_v45 }
 0x134   :  { %184 = vst.msk [vmem:[#allocation3] sm:$0xff] %vm26_vm0, %v182_v46 }
 0x139   :  { %v177_v47 = vld [vmem:[#allocation2 + $0x8] sm:$0xff] }
 0x13a   :  { %v183_v48 = vadd.f32 %v260_v42, %v177_v47 }
 0x13c   :  { %185 = vst.msk [vmem:[#allocation3 + $0x8] sm:$0xff] %vm26_vm0, %v183_v48 }
 0x13d   :  { %198 = dma.vmem_to_hbm [thread:$0]  %s191_s18, 256, %s193_s21, [#allocation4], %s293_s4, %s293_s4, %s294_s22  }
 0x13e   :  { %289 = dma.done.wait [#allocation4], 256  }
 0x13f   :  { %290 = vsyncadd [#allocation4], 4294967040 }
 0x140   :  { %203 = vsyncpa [#allocation4], 1 }

</bundles_post_ra>
